<compile_context>
chip_gen: v7x
topology: tpu7x:2x2x1
jax: 0.10.0
libtpu: 0.0.40
codegen_flags: <defaults>
</compile_context>

<pallas_src>
import jax
import jax.numpy as jnp
from jax.experimental import pallas as pl
from jax.experimental.pallas import tpu as pltpu

# Environment-derived sizes (CartPole-like, picked deterministically in-script)
N_STATES = 4      # env.observation_space.shape[0]
N_ACTIONS = 2     # env.action_space.n
HIDDEN = 128

K_PAD = 8         # N_STATES padded to the f32 sublane multiple
OUT_PAD = 128     # N_ACTIONS padded to a full lane width (lane-dense store)
TILE_B = 128      # batch tile for the grid once B exceeds one tile


def _round_up(n, m):
    return ((n + m - 1) // m) * m


def _mlp_kernel(x_ref, w1_ref, b1_ref, w2_ref, b2_ref, w3_ref, b3_ref, o_ref):
    # Everything is resident in VMEM; all matmuls are 128-wide MXU passes and
    # the output store is a full (tile_b, 128) unmasked slab.
    x = x_ref[...]                                                   # (tb, K_PAD)
    h1 = jnp.dot(x, w1_ref[...], preferred_element_type=jnp.float32) + b1_ref[...]
    h1 = jnp.maximum(h1, 0.0)                                        # ReLU
    h2 = jnp.dot(h1, w2_ref[...], preferred_element_type=jnp.float32) + b2_ref[...]
    h2 = jnp.maximum(h2, 0.0)                                        # ReLU
    out = jnp.dot(h2, w3_ref[...], preferred_element_type=jnp.float32) + b3_ref[...]
    o_ref[...] = out.astype(o_ref.dtype)                             # (tb, OUT_PAD)


def prepare_params(params):
    """One-time conversion of PyTorch-convention params ((out, in) weights) into
    the kernel layout: transposed to (in, out), cast to f32, zero-padded to
    aligned tiles. Call once; do NOT call per forward."""
    w1 = params["w1"].astype(jnp.float32)   # (HIDDEN, N_STATES)
    w2 = params["w2"].astype(jnp.float32)   # (HIDDEN, HIDDEN)
    w3 = params["w3"].astype(jnp.float32)   # (N_ACTIONS, HIDDEN)
    b1 = params["b1"].astype(jnp.float32)
    b2 = params["b2"].astype(jnp.float32)
    b3 = params["b3"].astype(jnp.float32)

    w1p = jnp.zeros((K_PAD, HIDDEN), jnp.float32).at[:N_STATES, :].set(w1.T)
    b1p = b1.reshape(1, HIDDEN)
    w2p = w2.T                               # (HIDDEN, HIDDEN)
    b2p = b2.reshape(1, HIDDEN)
    w3p = jnp.zeros((HIDDEN, OUT_PAD), jnp.float32).at[:, :N_ACTIONS].set(w3.T)
    b3p = jnp.zeros((1, OUT_PAD), jnp.float32).at[0, :N_ACTIONS].set(b3)
    return {"w1p": w1p, "b1p": b1p, "w2p": w2p, "b2p": b2p, "w3p": w3p, "b3p": b3p}


def net_forward(x, prepped):
    """x: (B, N_STATES). prepped: output of prepare_params (already laid out).
    Returns (B, N_ACTIONS) f32 action values."""
    B = x.shape[0]

    # Pad batch to an aligned size; tile with a grid once it exceeds TILE_B.
    Bp = _round_up(max(B, 1), 8)
    if Bp > TILE_B:
        Bp = _round_up(Bp, TILE_B)
        tile_b = TILE_B
    else:
        tile_b = Bp

    xp = jnp.zeros((Bp, K_PAD), jnp.float32)
    xp = xp.at[:B, :N_STATES].set(x.astype(jnp.float32))

    rep = lambda shape: pl.BlockSpec(shape, lambda i: (0, 0))  # replicated per tile

    out_padded = pl.pallas_call(
        _mlp_kernel,
        out_shape=jax.ShapeDtypeStruct((Bp, OUT_PAD), jnp.float32),
        grid=(Bp // tile_b,),
        in_specs=[
            pl.BlockSpec((tile_b, K_PAD), lambda i: (i, 0)),   # x batch tile
            rep((K_PAD, HIDDEN)),                              # w1
            rep((1, HIDDEN)),                                  # b1
            rep((HIDDEN, HIDDEN)),                             # w2
            rep((1, HIDDEN)),                                  # b2
            rep((HIDDEN, OUT_PAD)),                            # w3 (lane-dense)
            rep((1, OUT_PAD)),                                 # b3
        ],
        out_specs=pl.BlockSpec((tile_b, OUT_PAD), lambda i: (i, 0)),
        compiler_params=pltpu.CompilerParams(
            dimension_semantics=("parallel",),                 # v7x: split batch over TCs
        ),
    )(xp, prepped["w1p"], prepped["b1p"], prepped["w2p"], prepped["b2p"],
      prepped["w3p"], prepped["b3p"])

    return out_padded[:B, :N_ACTIONS]


def init_params(key):
    """Deterministic init mirroring the PyTorch module:
    weights ~ Normal(0, 0.1); biases use PyTorch Linear default U(-1/sqrt(fan_in), +)."""
    ks = jax.random.split(key, 6)

    def lin(kw, kb, fan_in, fan_out):
        w = 0.1 * jax.random.normal(kw, (fan_out, fan_in), jnp.float32)  # (out, in)
        bound = 1.0 / jnp.sqrt(jnp.float32(fan_in))
        b = jax.random.uniform(kb, (fan_out,), jnp.float32, -bound, bound)
        return w, b

    w1, b1 = lin(ks[0], ks[1], N_STATES, HIDDEN)
    w2, b2 = lin(ks[2], ks[3], HIDDEN, HIDDEN)
    w3, b3 = lin(ks[4], ks[5], HIDDEN, N_ACTIONS)
    return {"w1": w1, "b1": b1, "w2": w2, "b2": b2, "w3": w3, "b3": b3}


def reference_forward(x, params):
    h1 = jnp.maximum(x @ params["w1"].T + params["b1"], 0.0)
    h2 = jnp.maximum(h1 @ params["w2"].T + params["b2"], 0.0)
    return h2 @ params["w3"].T + params["b3"]


if __name__ == "__main__":
    key = jax.random.PRNGKey(0)
    k_param, k_x1, k_x2 = jax.random.split(key, 3)

    params = init_params(k_param)
    prepped = prepare_params(params)          # one-time layout prep (not per call)

    fwd = jax.jit(net_forward)

    # Small action-selection batch (B=2): single aligned tile path.
    x_small = jax.random.normal(k_x1, (2, N_STATES), jnp.float32)
    out_small = jax.block_until_ready(fwd(x_small, prepped))
    ref_small = reference_forward(x_small, params)
    assert out_small.shape == (2, N_ACTIONS)
    assert jnp.allclose(out_small, ref_small, atol=1e-5, rtol=1e-5), "mismatch (B=2)"

    # Replay-minibatch batch (B=256): exercises the batch-tile grid path.
    x_big = jax.random.normal(k_x2, (256, N_STATES), jnp.float32)
    out_big = jax.block_until_ready(fwd(x_big, prepped))
    ref_big = reference_forward(x_big, params)
    assert out_big.shape == (256, N_ACTIONS)
    assert jnp.allclose(out_big, ref_big, atol=1e-4, rtol=1e-5), "mismatch (B=256)"

    print("KERNEL_OK")
</pallas_src>

<mosaic_0001>
module attributes {stable_mosaic.version = 11 : i64} {
  func.func @_mlp_kernel(%arg0: i32, %arg1: memref<8x8xf32, #tpu.memory_space<vmem>>, %arg2: memref<8x128xf32, #tpu.memory_space<vmem>>, %arg3: memref<1x128xf32, #tpu.memory_space<vmem>>, %arg4: memref<128x128xf32, #tpu.memory_space<vmem>>, %arg5: memref<1x128xf32, #tpu.memory_space<vmem>>, %arg6: memref<128x128xf32, #tpu.memory_space<vmem>>, %arg7: memref<1x128xf32, #tpu.memory_space<vmem>>, %arg8: memref<8x128xf32, #tpu.memory_space<vmem>>) attributes {dimension_semantics = [#tpu.dimension_semantics<parallel>], iteration_bounds = array<i64: 1>, scalar_prefetch = 0 : i64, scratch_operands = 0 : i64, tpu.core_type = #tpu.core_type<tc>, window_params = [{transform_indices = @transform_0, window_bounds = array<i64: 8, 8>}, {pipeline_mode = #tpu.pipeline_mode<synchronous>, transform_indices = @transform_1, window_bounds = array<i64: 8, 128>}, {pipeline_mode = #tpu.pipeline_mode<synchronous>, transform_indices = @transform_2, window_bounds = array<i64: 1, 128>}, {pipeline_mode = #tpu.pipeline_mode<synchronous>, transform_indices = @transform_3, window_bounds = array<i64: 128, 128>}, {pipeline_mode = #tpu.pipeline_mode<synchronous>, transform_indices = @transform_4, window_bounds = array<i64: 1, 128>}, {pipeline_mode = #tpu.pipeline_mode<synchronous>, transform_indices = @transform_5, window_bounds = array<i64: 128, 128>}, {pipeline_mode = #tpu.pipeline_mode<synchronous>, transform_indices = @transform_6, window_bounds = array<i64: 1, 128>}, {transform_indices = @transform_7, window_bounds = array<i64: 8, 128>}]} {
    %c0 = arith.constant 0 : index
    %c0_0 = arith.constant 0 : index
    %0 = vector.load %arg1[%c0, %c0_0] : memref<8x8xf32, #tpu.memory_space<vmem>>, vector<8x8xf32>
    %c0_1 = arith.constant 0 : index
    %c0_2 = arith.constant 0 : index
    %1 = vector.load %arg2[%c0_1, %c0_2] : memref<8x128xf32, #tpu.memory_space<vmem>>, vector<8x128xf32>
    %cst = arith.constant dense<0.000000e+00> : vector<8x128xf32>
    %2 = tpu.matmul %0, %1, %cst {dimension_numbers = #tpu.dot_dimension_numbers<[1], [0], [0], [1], [0, 0, 1, 1], [], []>} : vector<8x8xf32>, vector<8x128xf32>, vector<8x128xf32> -> vector<8x128xf32>
    %c0_3 = arith.constant 0 : index
    %c0_4 = arith.constant 0 : index
    %3 = vector.load %arg3[%c0_3, %c0_4] : memref<1x128xf32, #tpu.memory_space<vmem>>, vector<1x128xf32>
    %4 = vector.broadcast %3 : vector<1x128xf32> to vector<8x128xf32>
    %5 = arith.addf %2, %4 : vector<8x128xf32>
    %cst_5 = arith.constant 0.000000e+00 : f32
    %6 = vector.broadcast %cst_5 : f32 to vector<8x128xf32>
    %7 = arith.maximumf %5, %6 : vector<8x128xf32>
    %c0_6 = arith.constant 0 : index
    %c0_7 = arith.constant 0 : index
    %8 = vector.load %arg4[%c0_6, %c0_7] : memref<128x128xf32, #tpu.memory_space<vmem>>, vector<128x128xf32>
    %cst_8 = arith.constant dense<0.000000e+00> : vector<8x128xf32>
    %9 = tpu.matmul %7, %8, %cst_8 {dimension_numbers = #tpu.dot_dimension_numbers<[1], [0], [0], [1], [0, 0, 1, 1], [], []>} : vector<8x128xf32>, vector<128x128xf32>, vector<8x128xf32> -> vector<8x128xf32>
    %c0_9 = arith.constant 0 : index
    %c0_10 = arith.constant 0 : index
    %10 = vector.load %arg5[%c0_9, %c0_10] : memref<1x128xf32, #tpu.memory_space<vmem>>, vector<1x128xf32>
    %11 = vector.broadcast %10 : vector<1x128xf32> to vector<8x128xf32>
    %12 = arith.addf %9, %11 : vector<8x128xf32>
    %cst_11 = arith.constant 0.000000e+00 : f32
    %13 = vector.broadcast %cst_11 : f32 to vector<8x128xf32>
    %14 = arith.maximumf %12, %13 : vector<8x128xf32>
    %c0_12 = arith.constant 0 : index
    %c0_13 = arith.constant 0 : index
    %15 = vector.load %arg6[%c0_12, %c0_13] : memref<128x128xf32, #tpu.memory_space<vmem>>, vector<128x128xf32>
    %cst_14 = arith.constant dense<0.000000e+00> : vector<8x128xf32>
    %16 = tpu.matmul %14, %15, %cst_14 {dimension_numbers = #tpu.dot_dimension_numbers<[1], [0], [0], [1], [0, 0, 1, 1], [], []>} : vector<8x128xf32>, vector<128x128xf32>, vector<8x128xf32> -> vector<8x128xf32>
    %c0_15 = arith.constant 0 : index
    %c0_16 = arith.constant 0 : index
    %17 = vector.load %arg7[%c0_15, %c0_16] : memref<1x128xf32, #tpu.memory_space<vmem>>, vector<1x128xf32>
    %18 = vector.broadcast %17 : vector<1x128xf32> to vector<8x128xf32>
    %19 = arith.addf %16, %18 : vector<8x128xf32>
    %c0_17 = arith.constant 0 : index
    %c0_18 = arith.constant 0 : index
    %20 = vector.load %arg8[%c0_17, %c0_18] : memref<8x128xf32, #tpu.memory_space<vmem>>, vector<8x128xf32>
    tpu.vector_store %arg8[%c0_17, %c0_18], %19 {strides = array<i32>} : memref<8x128xf32, #tpu.memory_space<vmem>>, vector<8x128xf32>,
    return
  }
  func.func @transform_0(%arg0: i32) -> (i32, i32) {
    %c0_i32 = arith.constant 0 : i32
    %c0_i32_0 = arith.constant 0 : i32
    return %arg0, %c0_i32 : i32, i32
  }
  func.func @transform_1(%arg0: i32) -> (i32, i32) {
    %c0_i32 = arith.constant 0 : i32
    %c0_i32_0 = arith.constant 0 : i32
    %c0_i32_1 = arith.constant 0 : i32
    return %c0_i32, %c0_i32_0 : i32, i32
  }
  func.func @transform_2(%arg0: i32) -> (i32, i32) {
    %c0_i32 = arith.constant 0 : i32
    %c0_i32_0 = arith.constant 0 : i32
    %c0_i32_1 = arith.constant 0 : i32
    return %c0_i32, %c0_i32_0 : i32, i32
  }
  func.func @transform_3(%arg0: i32) -> (i32, i32) {
    %c0_i32 = arith.constant 0 : i32
    %c0_i32_0 = arith.constant 0 : i32
    %c0_i32_1 = arith.constant 0 : i32
    return %c0_i32, %c0_i32_0 : i32, i32
  }
  func.func @transform_4(%arg0: i32) -> (i32, i32) {
    %c0_i32 = arith.constant 0 : i32
    %c0_i32_0 = arith.constant 0 : i32
    %c0_i32_1 = arith.constant 0 : i32
    return %c0_i32, %c0_i32_0 : i32, i32
  }
  func.func @transform_5(%arg0: i32) -> (i32, i32) {
    %c0_i32 = arith.constant 0 : i32
    %c0_i32_0 = arith.constant 0 : i32
    %c0_i32_1 = arith.constant 0 : i32
    return %c0_i32, %c0_i32_0 : i32, i32
  }
  func.func @transform_6(%arg0: i32) -> (i32, i32) {
    %c0_i32 = arith.constant 0 : i32
    %c0_i32_0 = arith.constant 0 : i32
    %c0_i32_1 = arith.constant 0 : i32
    return %c0_i32, %c0_i32_0 : i32, i32
  }
  func.func @transform_7(%arg0: i32) -> (i32, i32) {
    %c0_i32 = arith.constant 0 : i32
    %c0_i32_0 = arith.constant 0 : i32
    return %arg0, %c0_i32 : i32, i32
  }
}

</mosaic_0001>

<bundles_post_ra>
// kernel: net_forward.1
= control target key start
LH: loop header
LB: loop body
LE: loop exit
PB: predicated region body
PF: predicated region fallthrough
CT: control target
= control target key end

     0   :  { %12 = vsyncpa [#allocation3], 0  ;;  %s658_s0 = inlined_call_operand.vmem [shape: f32[8,8], index: 0, kind: input, shape index: {}]   ;;  %s659_s1 = inlined_call_operand.vmem [shape: f32[8,128], index: 1, kind: input, shape index: {}]   ;;  %s660_s2 = inlined_call_operand.vmem [shape: f32[1,128], index: 2, kind: input, shape index: {}]   ;;  %s661_s3 = inlined_call_operand.hbm [shape: f32[128,128], index: 3, kind: input, shape index: {}]   ;;  %s662_s4 = inlined_call_operand.vmem [shape: f32[1,128], index: 4, kind: input, shape index: {}]   ;;  %s663_s5 = inlined_call_operand.hbm [shape: f32[128,128], index: 5, kind: input, shape index: {}]   ;;  %s664_s6 = inlined_call_operand.vmem [shape: f32[1,128], index: 6, kind: input, shape index: {}]   ;;  %s665_s7 = inlined_call_operand.vmem [shape: f32[8,128], index: 7, kind: output, shape index: {}]  }
   0x1   :  { %13 = vsyncpa [#allocation5], 0  ;;  %s550_s24 = smov [#allocation2]   ;;  %s502_s28 = scalar_lea.hbm %s661_s3, 2048 }
   0x2   :  { %s25_s25 = sshll.u32 %s550_s24, 4  ;;  %p503_p0 = scmp.ne.s32.totalorder %s661_s3, %s502_s28  ;;  %s26_s25 = int_to_ptr.vmem [resolvable:$true] %s25_s25 }
   0x3   :  { %p506_p1 = scmp.lt.u32.totalorder %s502_s28, %s661_s3 }
   0x5   :  { %p508_p2 = pnand %p506_p1, %p503_p0 }
   0x7   :  { %511 = shalt.err (!%p508_p2)
}
   0x8   :  { %s512_s10 = scalar_lea.vmem %s26_s25, 2048  ;;  %p517_p4 = scmp.lt.s32.totalorder %s26_s25, %s26_s25 }
   0x9   :  { %p513_p3 = scmp.ne.s32.totalorder %s26_s25, %s512_s10  ;;  %p518_p5 = scmp.lt.s32.totalorder %s512_s10, %s512_s10 }
   0xb   :  { %p519_p6 = por %p518_p5, %p517_p4 }
   0xd   :  { %p520_p7 = pnand %p519_p6, %p513_p3 }
   0xf   :  { %523 = shalt.err (!%p520_p7)
}
  0x10   :  { %s551_s11 = smov 128   ;;  %s552_s12 = smov 8  }
  0x11   :  { %31 = dma.hbm_to_vmem [thread:$0]  %s661_s3, 2048, %s26_s25, [#allocation3], %s551_s11, %s551_s11, %s552_s12  }
  0x12   :  { %s553_s15 = smov [#allocation4]   ;;  %s524_s19 = scalar_lea.hbm %s663_s5, 2048 }
  0x13   :  { %s39_s16 = sshll.u32 %s553_s15, 4  ;;  %p525_p8 = scmp.ne.s32.totalorder %s663_s5, %s524_s19  ;;  %s40_s16 = int_to_ptr.vmem [resolvable:$true] %s39_s16 }
  0x14   :  { %p528_p9 = scmp.lt.u32.totalorder %s524_s19, %s663_s5 }
  0x16   :  { %p530_p10 = pnand %p528_p9, %p525_p8 }
  0x18   :  { %533 = shalt.err (!%p530_p10)
}
  0x19   :  { %s534_s24 = scalar_lea.vmem %s40_s16, 2048  ;;  %p539_p12 = scmp.lt.s32.totalorder %s40_s16, %s40_s16 }
  0x1a   :  { %p535_p11 = scmp.ne.s32.totalorder %s40_s16, %s534_s24  ;;  %p540_p13 = scmp.lt.s32.totalorder %s534_s24, %s534_s24 }
  0x1c   :  { %p541_p0 = por %p540_p13, %p539_p12 }
  0x1e   :  { %p542_p1 = pnand %p541_p0, %p535_p11 }
  0x20   :  { %545 = shalt.err (!%p542_p1)
}
  0x21   :  { %45 = dma.hbm_to_vmem [thread:$0]  %s663_s5, 2048, %s40_s16, [#allocation5], %s551_s11, %s551_s11, %s552_s12  }
  0x22   :  { %546 = dma.done.wait [#allocation3], 2048  }
  0x23   :  { %547 = vsyncadd [#allocation3], 4294965248 }
  0x24   :  { %548 = dma.done.wait [#allocation5], 2048  }
  0x25   :  { %549 = vsyncadd [#allocation5], 4294965248  ;;  %v554_v0 = vmov 0.0   ;;  %vm555_vm0 = vmmov 0   ;;  %v556_v1 = vmov 0.0|0.0   ;;  %vm63_vm1 = vcmask 64512  }
  0x26   :  { %372 = vmatprep.subr.mxu0 %v554_v0  ;;  %374 = vmatprep.mubr.msk.f32.mxu0 %vm555_vm0, %v554_v0  ;;  %v55_v2 = vld [vmem:[%s659_s1] sm:$0xff]  ;;  %v139_v5 = vld [vmem:[#allocation2 + $0x8] sm:$0xff]  ;;  %v140_v6 = vld [vmem:[#allocation2 + $0x10] sm:$0xff] }
  0x27   :  { %447 = vmatprep.subr.bf16.mxu1 %v556_v1  ;;  %409 = vmatprep.mubr.msk.f32.mxu1 %vm555_vm0, %v554_v0  ;;  %v54_v3 = vld [vmem:[%s658_s0] sm:$0xff]  ;;  %v141_v7 = vld [vmem:[#allocation2 + $0x18] sm:$0xff]  ;;  %v143_v11 = vld [vmem:[#allocation2 + $0x28] sm:$0xff] }
  0x28   :  { %v138_v4 = vld [vmem:[#allocation2] sm:$0xff]  ;;  %373 = vmatpush3.msra.mxu0 %v55_v2  ;;  %v451_v9 = vpack.c.bf16 %v141_v7, %v140_v6  ;;  %v144_v13 = vld [vmem:[#allocation2 + $0x30] sm:$0xff]  ;;  %v145_v14 = vld [vmem:[#allocation2 + $0x38] sm:$0xff] }
  0x29   :  { %375 = vmatmul.mubr.msk.f32.vlgmr.msra.gmra.mrb[0].mxu0 %vm63_vm1, %v54_v3  ;;  %v448_v8 = vpack.c.bf16 %v139_v5, %v138_v4  ;;  %471 = vmatprep.subr.bf16.mxu0 %v556_v1  ;;  %v142_v10 = vld [vmem:[#allocation2 + $0x20] sm:$0xff]  ;;  %v457_v15 = vpack.c.bf16 %v145_v14, %v144_v13  ;;  %v147_v17 = vld [vmem:[#allocation2 + $0x48] sm:$0xff]  ;;  %v148_v19 = vld [vmem:[#allocation2 + $0x50] sm:$0xff] }
  0x2a   :  { %444 = vmatprep.mubr.msk.f32.mxu0 %vm555_vm0, %v554_v0  ;;  %v454_v12 = vpack.c.bf16 %v143_v11, %v142_v10  ;;  %v146_v16 = vld [vmem:[#allocation2 + $0x40] sm:$0xff]  ;;  %v149_v20 = vld [vmem:[#allocation2 + $0x58] sm:$0xff]  ;;  %v151_v23 = vld [vmem:[#allocation2 + $0x68] sm:$0xff] }
  0x2b   :  { %449 = vmatpush3.bf16.msra.mxu1 %v448_v8  ;;  %v460_v18 = vpack.c.bf16 %v147_v17, %v146_v16  ;;  %v463_v21 = vpack.c.bf16 %v149_v20, %v148_v19  ;;  %v150_v22 = vld [vmem:[#allocation2 + $0x60] sm:$0xff]  ;;  %v152_v25 = vld [vmem:[#allocation2 + $0x70] sm:$0xff]  ;;  %v153_v26 = vld [vmem:[#allocation2 + $0x78] sm:$0xff] }
  0x2c   :  { %450 = vmatprep.subr.bf16.mxu1 %v556_v1  ;;  %v466_v24 = vpack.c.bf16 %v151_v23, %v150_v22  ;;  %v469_v27 = vpack.c.bf16 %v153_v26, %v152_v25  ;;  %v232_v28 = vld [vmem:[#allocation4] sm:$0xff]  ;;  %v233_v29 = vld [vmem:[#allocation4 + $0x8] sm:$0xff]  ;;  %v234_v30 = vld [vmem:[#allocation4 + $0x10] sm:$0xff] }
  0x2d   :  { %v472_v31 = vpack.c.bf16 %v233_v29, %v232_v28  ;;  %v235_v32 = vld [vmem:[#allocation4 + $0x18] sm:$0xff]  ;;  %v236_v34 = vld [vmem:[#allocation4 + $0x20] sm:$0xff]  ;;  %v237_v35 = vld [vmem:[#allocation4 + $0x28] sm:$0xff] }
  0x2e   :  { %v475_v33 = vpack.c.bf16 %v235_v32, %v234_v30  ;;  %v478_v36 = vpack.c.bf16 %v237_v35, %v236_v34  ;;  %v238_v37 = vld [vmem:[#allocation4 + $0x30] sm:$0xff]  ;;  %v239_v38 = vld [vmem:[#allocation4 + $0x38] sm:$0xff]  ;;  %v240_v40 = vld [vmem:[#allocation4 + $0x40] sm:$0xff] }
  0x2f   :  { %452 = vmatpush3.bf16.msra.mxu1 %v451_v9  ;;  %473 = vmatpush3.bf16.msra.mxu0 %v472_v31  ;;  %v481_v39 = vpack.c.bf16 %v239_v38, %v238_v37  ;;  %v241_v41 = vld [vmem:[#allocation4 + $0x48] sm:$0xff]  ;;  %v242_v43 = vld [vmem:[#allocation4 + $0x50] sm:$0xff]  ;;  %v243_v44 = vld [vmem:[#allocation4 + $0x58] sm:$0xff] }
  0x30   :  { %453 = vmatprep.subr.bf16.mxu1 %v556_v1  ;;  %474 = vmatprep.subr.bf16.mxu0 %v556_v1  ;;  %v484_v42 = vpack.c.bf16 %v241_v41, %v240_v40  ;;  %v487_v45 = vpack.c.bf16 %v243_v44, %v242_v43  ;;  %v244_v46 = vld [vmem:[#allocation4 + $0x60] sm:$0xff]  ;;  %v245_v47 = vld [vmem:[#allocation4 + $0x68] sm:$0xff]  ;;  %v246_v54 = vld [vmem:[#allocation4 + $0x70] sm:$0xff] }
  0x31   :  { %v490_v48 = vpack.c.bf16 %v245_v47, %v244_v46  ;;  %v332_v49 = vld [vmem:[%s660_s2] ss:$0 sm:$0xff]  ;;  %v247_v55 = vld [vmem:[#allocation4 + $0x78] sm:$0xff] }
  0x32   :  { %v493_v56 = vpack.c.bf16 %v247_v55, %v246_v54  ;;  %v334_v57 = vld [vmem:[%s662_s4] ss:$0 sm:$0xff] }
  0x33   :  { %455 = vmatpush3.bf16.msra.mxu1 %v454_v12  ;;  %476 = vmatpush3.bf16.msra.mxu0 %v475_v33  ;;  %v335_v62 = vld [vmem:[%s664_s6] ss:$0 sm:$0xff] }
  0x34   :  { %456 = vmatprep.subr.bf16.mxu1 %v556_v1  ;;  %477 = vmatprep.subr.bf16.mxu0 %v556_v1 }
  0x37   :  { %458 = vmatpush3.bf16.msra.mxu1 %v457_v15  ;;  %479 = vmatpush3.bf16.msra.mxu0 %v478_v36 }
  0x38   :  { %459 = vmatprep.subr.bf16.mxu1 %v556_v1  ;;  %480 = vmatprep.subr.bf16.mxu0 %v556_v1 }
  0x3b   :  { %461 = vmatpush3.bf16.msra.mxu1 %v460_v18  ;;  %482 = vmatpush3.bf16.msra.mxu0 %v481_v39 }
  0x3c   :  { %462 = vmatprep.subr.bf16.mxu1 %v556_v1  ;;  %483 = vmatprep.subr.bf16.mxu0 %v556_v1 }
  0x3f   :  { %464 = vmatpush3.bf16.msra.mxu1 %v463_v21  ;;  %485 = vmatpush3.bf16.msra.mxu0 %v484_v42 }
  0x40   :  { %465 = vmatprep.subr.bf16.mxu1 %v556_v1  ;;  %486 = vmatprep.subr.bf16.mxu0 %v556_v1 }
  0x43   :  { %467 = vmatpush3.bf16.msra.mxu1 %v466_v24  ;;  %488 = vmatpush3.bf16.msra.mxu0 %v487_v45 }
  0x44   :  { %468 = vmatprep.subr.bf16.mxu1 %v556_v1  ;;  %489 = vmatprep.subr.bf16.mxu0 %v556_v1 }
  0x47   :  { %470 = vmatpush3.bf16.msra.mxu1 %v469_v27  ;;  %491 = vmatpush3.bf16.msra.mxu0 %v490_v48 }
  0x48   :  { %492 = vmatprep.subr.bf16.mxu0 %v556_v1 }
  0x4b   :  { %494 = vmatpush3.bf16.msra.mxu0 %v493_v56 }
  0xfc   :  { %v133_v50 = vpop.f32.mrb[0].mxu0 }
  0xfd   :  { %v134_v51 = vadd.f32 %v332_v49, %v133_v50  ;;  %v376_v52 = vpop.f32.mrb[1].mxu0 }
  0xff   :  { %v137_v53 = vmax.f32 %v134_v51, 0.0 }
 0x101   :  { %410 = vmatmul.mubr.f32.vlgmr.msra.gmra.mrb[0].mxu1 %v137_v53 }
 0x1d4   :  { %v227_v58 = vpop.f32.mrb[0].mxu1 }
 0x1d5   :  { %v228_v59 = vadd.f32 %v334_v57, %v227_v58  ;;  %v411_v60 = vpop.f32.mrb[1].mxu1 }
 0x1d7   :  { %v231_v61 = vmax.f32 %v228_v59, 0.0 }
 0x1d9   :  { %445 = vmatmul.mubr.f32.vlgmr.msra.gmra.mrb[2].mxu0 %v231_v61 }
 0x2ac   :  { %v321_v63 = vpop.f32.mrb[2].mxu0 }
 0x2ad   :  { %v322_v0 = vadd.f32 %v335_v62, %v321_v63  ;;  %v446_v1 = vpop.f32.mrb[3].mxu0 }
 0x2af   :  { %325 = vst [vmem:[%s665_s7] sm:$0xff] %v322_v0 }
 0x2b0   :  { %330 = vsyncpa [#allocation3], 1 }
 0x2b1   :  { %331 = vsyncpa [#allocation5], 1 }

</bundles_post_ra>
